<compile_context>
chip_gen: v7x
topology: tpu7x:2x2x1
jax: 0.10.0
libtpu: 0.0.40
codegen_flags: <defaults>
</compile_context>

<pallas_src>
import jax
import jax.numpy as jnp
from jax import lax
from jax.experimental import pallas as pl
from jax.experimental.pallas import tpu as pltpu


def _self_attn_kernel(x_ref, g_ref, gb_ref, gamma_ref, out_ref, attn_ref,
                      proj_ref):
    """One (batch, query-tile) step.

    x_ref    : (1, C, W)     raw input for this batch element
    g_ref    : (C_all, C)    stacked folded weights [Wq^T Wk ; Wv ; (Wk^T bq)^T ; 0]
    gb_ref   : (C_all, 1)    stacked folded biases  [Wq^T bk ; bv ; bq·bk ; 0]
    gamma_ref: (1,) scalar in SMEM
    out_ref  : (1, C, TQ)
    attn_ref : (1, TQ, W)
    proj_ref : (C_all, W) VMEM scratch = G @ x + gb   (computed once per batch)
    """
    qt = pl.program_id(1)
    C = out_ref.shape[1]
    TQ = out_ref.shape[2]

    x_view = x_ref.at[0]                                     # (C, W) view

    # Folded k-side / v projections: computed once per batch element and
    # reused by every query tile (qt is the inner, "arbitrary" grid axis).
    @pl.when(qt == 0)
    def _():
        xw = x_view[...].astype(jnp.float32)                 # (C, W)
        proj_ref[...] = (
            jnp.dot(g_ref[...], xw, preferred_element_type=jnp.float32)
            + gb_ref[...]                                    # (C_all, 1) bcast
        )

    # Query tile: columns [qt*TQ, qt*TQ + TQ) of the input.
    start = pl.multiple_of(qt * TQ, TQ)
    xq = x_view[:, pl.ds(start, TQ)].astype(jnp.float32)     # (C, TQ)

    km = proj_ref[0:C, :]                                    # (C, W)  k-side
    kb = proj_ref[2 * C:2 * C + 1, :]                        # (1, W)  scalar term

    # energy[i, j] = (Wq x_i + bq)^T (Wk x_j + bk); contraction over C.
    energy = lax.dot_general(xq, km, (((0,), (0,)), ((), ())),
                             preferred_element_type=jnp.float32) + kb  # (TQ, W)

    # Row softmax (exact, f32).  Softmax is over the full last axis, so
    # query-row tiling needs no online/flash correction.
    e_max = jnp.max(energy, axis=-1, keepdims=True)
    p = jnp.exp(energy - e_max)
    attn = p * pl.reciprocal(jnp.sum(p, axis=-1, keepdims=True), approx=False)

    attn_ref[0] = attn.astype(attn_ref.dtype)

    # out[c, i] = sum_j v[c, j] * attn[i, j]   (contraction over W)
    v = proj_ref[C:2 * C, :]                                 # (C, W)
    out_t = lax.dot_general(v, attn, (((1,), (1,)), ((), ())),
                            preferred_element_type=jnp.float32)   # (C, TQ)

    gamma = gamma_ref[0]
    out_ref[0] = (gamma * out_t + xq).astype(out_ref.dtype)


def _pick_tq(W):
    """Query-tile width: 128-multiple dividing W, else a single full tile."""
    if W % 128 == 0:
        return 256 if (W % 256 == 0 and W > 256) else 128
    return W  # block dims equal to full array dims are always legal.


def _vmem_limit_bytes(C, C_all, W, TQ):
    f32 = 4
    blocks = 2 * f32 * (C * W + C_all * C + C_all + C * TQ + TQ * W)
    scratch = f32 * (C_all * W)
    work = 4 * f32 * TQ * W
    est = int(1.5 * (blocks + scratch + work))
    # Clamp: >=32 MiB (default scoped limit), <=64 MiB (v7x physical VMEM).
    return max(32 * 1024 * 1024, min(est, 64 * 1024 * 1024))


def self_attn(x, wq, bq, wk, bk, wv, bv, gamma, *, tq=None):
    """x: (B, C, W).  wq/wk: (d, C), bq/bk: (d, 1), wv: (C, C), bv: (C, 1),
    gamma: (1,).  Returns (out (B, C, W), attention (B, W, W))."""
    B, C, W = x.shape
    f32 = jnp.float32
    hi = lax.Precision.HIGHEST

    TQ = tq if tq is not None else _pick_tq(W)
    assert W % TQ == 0
    n_q = W // TQ

    # --- Fold projections (one-time, tiny, outside the kernel) -------------
    wq = wq.astype(f32); wk = wk.astype(f32); wv = wv.astype(f32)
    bq = bq.reshape(-1).astype(f32)
    bk = bk.reshape(-1).astype(f32)
    bv = bv.reshape(-1).astype(f32)

    A = jnp.dot(wq.T, wk, precision=hi)        # (C, C)  Wq^T Wk
    u = jnp.dot(wq.T, bk, precision=hi)        # (C,)    Wq^T bk
    r = jnp.dot(wk.T, bq, precision=hi)        # (C,)    Wk^T bq
    s = jnp.dot(bq, bk, precision=hi)          # scalar  bq·bk

    C_all = ((2 * C + 1 + 7) // 8) * 8
    pad = C_all - (2 * C + 1)
    G = jnp.concatenate(
        [A, wv, r[None, :], jnp.zeros((pad, C), f32)], axis=0)    # (C_all, C)
    gb = jnp.concatenate(
        [u, bv, s[None], jnp.zeros((pad,), f32)])[:, None]        # (C_all, 1)

    gamma = gamma.reshape((1,)).astype(f32)
    x = x.astype(f32)

    grid_spec = pltpu.PrefetchScalarGridSpec(
        num_scalar_prefetch=0,
        grid=(B, n_q),
        in_specs=[
            # Constant block index across qt → Pallas does not re-DMA x per
            # query tile; folded weights likewise fetched once.
            pl.BlockSpec((1, C, W), lambda b, qt: (b, 0, 0)),       # x
            pl.BlockSpec((C_all, C), lambda b, qt: (0, 0)),         # G
            pl.BlockSpec((C_all, 1), lambda b, qt: (0, 0)),         # gb
            pl.BlockSpec(memory_space=pltpu.MemorySpace.SMEM),      # gamma
        ],
        out_specs=[
            pl.BlockSpec((1, C, TQ), lambda b, qt: (b, 0, qt)),     # out
            pl.BlockSpec((1, TQ, W), lambda b, qt: (b, qt, 0)),     # attention
        ],
        scratch_shapes=[
            pltpu.VMEM((C_all, W), jnp.float32),   # proj = G @ x + gb
        ],
    )

    return pl.pallas_call(
        _self_attn_kernel,
        out_shape=(
            jax.ShapeDtypeStruct((B, C, W), x.dtype),
            jax.ShapeDtypeStruct((B, W, W), jnp.float32),
        ),
        grid_spec=grid_spec,
        compiler_params=pltpu.CompilerParams(
            # qt axis carries the per-batch proj scratch → must stay
            # "arbitrary"; batch axis is megacore-parallel.
            dimension_semantics=("parallel", "arbitrary"),
            vmem_limit_bytes=_vmem_limit_bytes(C, C_all, W, TQ),
        ),
    )(x, G, gb, gamma)


def self_attn_ref(x, wq, bq, wk, bk, wv, bv, gamma):
    """Pure-JAX reference for correctness checking (biases kept (d,1)/(C,1))."""
    q = jnp.einsum("dc,bcw->bdw", wq, x) + bq[None]        # (B, d, W)
    k = jnp.einsum("dc,bcw->bdw", wk, x) + bk[None]        # (B, d, W)
    v = jnp.einsum("oc,bcw->bow", wv, x) + bv[None]        # (B, C, W)
    energy = jnp.einsum("bdi,bdj->bij", q, k)              # (B, W, W)
    attn = jax.nn.softmax(energy, axis=-1)
    out = jnp.einsum("bcj,bij->bci", v, attn)              # (B, C, W)
    return gamma[0] * out + x, attn


if __name__ == "__main__":
    # Small but tiling-exercising shapes: W=256 with TQ=128 → 2 query tiles.
    B, C, W = 2, 16, 256          # in_dim = C = 16, so d = C // 8 = 2
    d = C // 8

    key = jax.random.PRNGKey(0)
    ks = jax.random.split(key, 8)

    x = jax.random.normal(ks[0], (B, C, W), dtype=jnp.float32)

    # Conv1d(kernel_size=1) weights: (out_ch, in_ch); default torch init range.
    bound = 1.0 / (C ** 0.5)
    wq = jax.random.uniform(ks[1], (d, C), jnp.float32, -bound, bound)
    bq = jax.random.uniform(ks[2], (d, 1), jnp.float32, -bound, bound)
    wk = jax.random.uniform(ks[3], (d, C), jnp.float32, -bound, bound)
    bk = jax.random.uniform(ks[4], (d, 1), jnp.float32, -bound, bound)
    wv = jax.random.uniform(ks[5], (C, C), jnp.float32, -bound, bound)
    bv = jax.random.uniform(ks[6], (C, 1), jnp.float32, -bound, bound)

    ok = True
    # gamma = 0 exactly as nn.Parameter(torch.zeros(1)), plus a nonzero gamma
    # to actually exercise the residual/scale path.
    for g in (0.0, 0.75):
        gamma = jnp.full((1,), g, dtype=jnp.float32)

        out, attn = self_attn(x, wq, bq, wk, bk, wv, bv, gamma)
        jax.block_until_ready((out, attn))

        out_r, attn_r = self_attn_ref(x, wq, bq, wk, bk, wv, bv, gamma)
        ok &= bool(jnp.allclose(out, out_r, atol=1e-4, rtol=1e-4))
        ok &= bool(jnp.allclose(attn, attn_r, atol=1e-4, rtol=1e-4))

    assert ok
    print("KERNEL_OK")
</pallas_src>

<mosaic_0001>
module attributes {stable_mosaic.version = 11 : i64} {
  func.func @_self_attn_kernel(%arg0: i32, %arg1: i32, %arg2: memref<1x16x256xf32, #tpu.memory_space<vmem>>, %arg3: memref<40x16xf32, #tpu.memory_space<vmem>>, %arg4: memref<40x1xf32, #tpu.memory_space<vmem>>, %arg5: memref<1xf32, #tpu.memory_space<smem>>, %arg6: memref<1x16x128xf32, #tpu.memory_space<vmem>>, %arg7: memref<1x128x256xf32, #tpu.memory_space<vmem>>, %arg8: memref<40x256xf32, #tpu.memory_space<vmem>>) attributes {dimension_semantics = [#tpu.dimension_semantics<parallel>, #tpu.dimension_semantics<arbitrary>], iteration_bounds = array<i64: 2, 2>, scalar_prefetch = 0 : i64, scratch_operands = 1 : i64, tpu.core_type = #tpu.core_type<tc>, window_params = [{transform_indices = @transform_0, window_bounds = array<i64: 1, 16, 256>}, {pipeline_mode = #tpu.pipeline_mode<synchronous>, transform_indices = @transform_1, window_bounds = array<i64: 40, 16>}, {pipeline_mode = #tpu.pipeline_mode<synchronous>, transform_indices = @transform_2, window_bounds = array<i64: 40, 1>}, {transform_indices = @transform_3, window_bounds = array<i64: 1>}, {transform_indices = @transform_4, window_bounds = array<i64: 1, 16, 128>}, {transform_indices = @transform_5, window_bounds = array<i64: 1, 128, 256>}]} {
    %c0_i32 = arith.constant 0 : i32
    %0 = arith.cmpi eq, %arg1, %c0_i32 : i32
    %1 = arith.extui %0 : i1 to i32
    %c0_i32_0 = arith.constant 0 : i32
    %c0_i32_1 = arith.constant 0 : i32
    %2 = arith.cmpi ne, %1, %c0_i32_1 : i32
    scf.if %2 {
      %36 = arith.index_cast %c0_i32_0 : i32 to index
      %c0_19 = arith.constant 0 : index
      %c0_20 = arith.constant 0 : index
      %37 = vector.load %arg2[%36, %c0_19, %c0_20] : memref<1x16x256xf32, #tpu.memory_space<vmem>>, vector<1x16x256xf32>
      %38 = vector.shape_cast %37 : vector<1x16x256xf32> to vector<16x256xf32>
      %c0_21 = arith.constant 0 : index
      %c0_22 = arith.constant 0 : index
      %39 = vector.load %arg3[%c0_21, %c0_22] : memref<40x16xf32, #tpu.memory_space<vmem>>, vector<40x16xf32>
      %cst_23 = arith.constant dense<0.000000e+00> : vector<40x256xf32>
      %40 = tpu.matmul %39, %38, %cst_23 {dimension_numbers = #tpu.dot_dimension_numbers<[1], [0], [0], [1], [0, 0, 1, 1], [], []>} : vector<40x16xf32>, vector<16x256xf32>, vector<40x256xf32> -> vector<40x256xf32>
      %c0_24 = arith.constant 0 : index
      %c0_25 = arith.constant 0 : index
      %41 = vector.load %arg4[%c0_24, %c0_25] : memref<40x1xf32, #tpu.memory_space<vmem>>, vector<40x1xf32>
      %42 = vector.broadcast %41 : vector<40x1xf32> to vector<40x256xf32>
      %43 = arith.addf %40, %42 : vector<40x256xf32>
      %c0_26 = arith.constant 0 : index
      %c0_27 = arith.constant 0 : index
      %44 = vector.load %arg8[%c0_26, %c0_27] : memref<40x256xf32, #tpu.memory_space<vmem>>, vector<40x256xf32>
      tpu.vector_store %arg8[%c0_26, %c0_27], %43 {strides = array<i32>} : memref<40x256xf32, #tpu.memory_space<vmem>>, vector<40x256xf32>,
    } else {
    }
    %c128_i32 = arith.constant 128 : i32
    %3 = arith.muli %arg1, %c128_i32 : i32
    %4 = tpu.assume_multiple %3, 128 : i32
    %c0_i32_2 = arith.constant 0 : i32
    %c0_i32_3 = arith.constant 0 : i32
    %c0_i32_4 = arith.constant 0 : i32
    %5 = tpu.memref_slice %arg2[%c0_i32_2, %c0_i32_3, %c0_i32_4] : memref<1x16x256xf32, #tpu.memory_space<vmem>> -> memref<1x16x256xf32, #tpu.memory_space<vmem>>
    %6 = tpu.memref_squeeze %5 : memref<1x16x256xf32, #tpu.memory_space<vmem>> -> memref<16x256xf32, #tpu.memory_space<vmem>>
    %c0 = arith.constant 0 : index
    %7 = arith.index_cast %4 : i32 to index
    %8 = vector.load %6[%c0, %7] : memref<16x256xf32, #tpu.memory_space<vmem>>, vector<16x128xf32>
    %c0_5 = arith.constant 0 : index
    %c0_6 = arith.constant 0 : index
    %9 = vector.load %arg8[%c0_5, %c0_6] : memref<40x256xf32, #tpu.memory_space<vmem>>, vector<16x256xf32>
    %c32 = arith.constant 32 : index
    %c0_7 = arith.constant 0 : index
    %10 = vector.load %arg8[%c32, %c0_7] : memref<40x256xf32, #tpu.memory_space<vmem>>, vector<1x256xf32>
    %cst = arith.constant dense<0.000000e+00> : vector<128x256xf32>
    %11 = tpu.matmul %8, %9, %cst {dimension_numbers = #tpu.dot_dimension_numbers<[0], [0], [1], [1], [0, 1, 1, 1], [], []>} : vector<16x128xf32>, vector<16x256xf32>, vector<128x256xf32> -> vector<128x256xf32>
    %12 = vector.broadcast %10 : vector<1x256xf32> to vector<128x256xf32>
    %13 = arith.addf %11, %12 : vector<128x256xf32>
    %cst_8 = arith.constant dense<0xFF800000> : vector<128xf32>
    %14 = vector.multi_reduction <maximumf>, %13, %cst_8 [1] : vector<128x256xf32> to vector<128xf32>
    %15 = vector.shape_cast %14 : vector<128xf32> to vector<128x1xf32>
    %16 = vector.broadcast %15 : vector<128x1xf32> to vector<128x256xf32>
    %17 = arith.subf %13, %16 : vector<128x256xf32>
    %18 = math.exp %17 : vector<128x256xf32>
    %cst_9 = arith.constant dense<0.000000e+00> : vector<128xf32>
    %19 = vector.multi_reduction <add>, %18, %cst_9 [1] : vector<128x256xf32> to vector<128xf32>
    %20 = vector.shape_cast %19 : vector<128xf32> to vector<128x1xf32>
    %21 = tpu.reciprocal %20 : vector<128x1xf32> -> vector<128x1xf32>
    %22 = vector.broadcast %21 : vector<128x1xf32> to vector<128x256xf32>
    %23 = arith.mulf %18, %22 : vector<128x256xf32>
    %c0_10 = arith.constant 0 : index
    %c0_11 = arith.constant 0 : index
    %c0_12 = arith.constant 0 : index
    %24 = vector.load %arg7[%c0_10, %c0_11, %c0_12] : memref<1x128x256xf32, #tpu.memory_space<vmem>>, vector<1x128x256xf32>
    %25 = vector.shape_cast %24 : vector<1x128x256xf32> to vector<128x256xf32>
    %26 = vector.shape_cast %23 : vector<128x256xf32> to vector<1x128x256xf32>
    tpu.vector_store %arg7[%c0_10, %c0_11, %c0_12], %26 {strides = array<i32>} : memref<1x128x256xf32, #tpu.memory_space<vmem>>, vector<1x128x256xf32>,
    %c16 = arith.constant 16 : index
    %c0_13 = arith.constant 0 : index
    %27 = vector.load %arg8[%c16, %c0_13] : memref<40x256xf32, #tpu.memory_space<vmem>>, vector<16x256xf32>
    %cst_14 = arith.constant dense<0.000000e+00> : vector<16x128xf32>
    %28 = tpu.matmul %27, %23, %cst_14 {dimension_numbers = #tpu.dot_dimension_numbers<[1], [1], [0], [0], [0, 0, 1, 0], [], []>} : vector<16x256xf32>, vector<128x256xf32>, vector<16x128xf32> -> vector<16x128xf32>
    %c0_15 = arith.constant 0 : index
    %29 = memref.load %arg5[%c0_15] : memref<1xf32, #tpu.memory_space<smem>>
    %30 = vector.broadcast %29 : f32 to vector<16x128xf32>
    %31 = arith.mulf %30, %28 : vector<16x128xf32>
    %32 = arith.addf %31, %8 : vector<16x128xf32>
    %c0_16 = arith.constant 0 : index
    %c0_17 = arith.constant 0 : index
    %c0_18 = arith.constant 0 : index
    %33 = vector.load %arg6[%c0_16, %c0_17, %c0_18] : memref<1x16x128xf32, #tpu.memory_space<vmem>>, vector<1x16x128xf32>
    %34 = vector.shape_cast %33 : vector<1x16x128xf32> to vector<16x128xf32>
    %35 = vector.shape_cast %32 : vector<16x128xf32> to vector<1x16x128xf32>
    tpu.vector_store %arg6[%c0_16, %c0_17, %c0_18], %35 {strides = array<i32>} : memref<1x16x128xf32, #tpu.memory_space<vmem>>, vector<1x16x128xf32>,
    return
  }
  func.func @transform_0(%arg0: i32, %arg1: i32) -> (i32, i32, i32) {
    %c0_i32 = arith.constant 0 : i32
    %c0_i32_0 = arith.constant 0 : i32
    %c0_i32_1 = arith.constant 0 : i32
    return %arg0, %c0_i32, %c0_i32_0 : i32, i32, i32
  }
  func.func @transform_1(%arg0: i32, %arg1: i32) -> (i32, i32) {
    %c0_i32 = arith.constant 0 : i32
    %c0_i32_0 = arith.constant 0 : i32
    %c0_i32_1 = arith.constant 0 : i32
    return %c0_i32, %c0_i32_0 : i32, i32
  }
  func.func @transform_2(%arg0: i32, %arg1: i32) -> (i32, i32) {
    %c0_i32 = arith.constant 0 : i32
    %c0_i32_0 = arith.constant 0 : i32
    %c0_i32_1 = arith.constant 0 : i32
    return %c0_i32, %c0_i32_0 : i32, i32
  }
  func.func @transform_3(%arg0: i32, %arg1: i32) -> i32 {
    %c0_i32 = arith.constant 0 : i32
    %c0_i32_0 = arith.constant 0 : i32
    return %c0_i32 : i32
  }
  func.func @transform_4(%arg0: i32, %arg1: i32) -> (i32, i32, i32) {
    %c0_i32 = arith.constant 0 : i32
    %c0_i32_0 = arith.constant 0 : i32
    return %arg0, %c0_i32, %arg1 : i32, i32, i32
  }
  func.func @transform_5(%arg0: i32, %arg1: i32) -> (i32, i32, i32) {
    %c0_i32 = arith.constant 0 : i32
    %c0_i32_0 = arith.constant 0 : i32
    return %arg0, %arg1, %c0_i32 : i32, i32, i32
  }
}

</mosaic_0001>

<bundles_post_ra>
// kernel: tpu_custom_call.1
= control target key start
LH: loop header
LB: loop body
LE: loop exit
PB: predicated region body
PF: predicated region fallthrough
CT: control target
= control target key end

     0   :  { %s2208_s0 = inlined_call_operand.vmem [shape: f32[2,16,256], index: 0, kind: input, shape index: {}]   ;;  %s2209_s1 = inlined_call_operand.vmem [shape: f32[40,16], index: 1, kind: input, shape index: {}]   ;;  %s2210_s2 = inlined_call_operand.vmem [shape: f32[40,1], index: 2, kind: input, shape index: {}]   ;;  %s2211_s3 = inlined_call_operand.<no memory space> [shape: f32[1], index: 3, kind: input, shape index: {}]   ;;  %s2212_s4 = inlined_call_operand.hbm [shape: f32[2,16,256], index: 4, kind: output, shape index: {0}]   ;;  %s2213_s5 = inlined_call_operand.hbm [shape: f32[2,256,256], index: 5, kind: output, shape index: {1}]  }
   0x1   :  { %2214 = sst [smem:[#allocation10_spill]] %s2208_s0 }
   0x2   :  { %11 = sst [smem:[#allocation3]] %s2211_s3 }
   0x3   :  { %12 = vsyncpa [#allocation5], 0 }
   0x4   :  { %14 = vsyncpa [#allocation5 + $0x1], 0 }
   0x5   :  { %15 = vsyncpa [#allocation7], 0 }
   0x6   :  { %17 = vsyncpa [#allocation7 + $0x1], 0  ;;  %s1630_s20 = smov 0   ;;  %s1632_s21 = smov 0  }
   0x7   :  { %s1634_s22 = smov 0   ;;  %s1636_s23 = smov 0  }
   0x8   :  { %s1638_s24 = smov 0   ;;  %s1640_s25 = smov 0  }
   0x9   :  { %s1642_s26 = smov 0   ;;  %s1644_s27 = smov 0  }
   0xa LB: > { %s1192_s3 = sadd.s32 4294967295, %s1586_s27   ;;  %s1193_s28 = sadd.s32 4294967294, %s1586_s27   ;;  %s1586_s27 = sphi %s1644_s27, %s23_s27   ;;  %s1582_s26 = sphi %s1642_s26, %s2224_s26   ;;  %s1578_s25 = sphi %s1640_s25, %s2223_s25   ;;  %s1574_s24 = sphi %s1638_s24, %s2222_s24   ;;  %s1570_s23 = sphi %s1636_s23, %s2221_s23   ;;  %s1566_s22 = sphi %s1634_s22, %s2220_s22   ;;  %s1562_s21 = sphi %s1632_s21, %s2219_s21   ;;  %s1558_s20 = sphi %s1630_s20, %s2218_s20  }
   0xb   : > { %s32_s29 = sadd.s32 1, %s1578_s25  ;;  %s35_s30 = sadd.s32 1, %s1582_s26 }
   0xc   : > { %p33_p0 = scmp.ge.s32.totalorder %s32_s29, 2  ;;  %p143_p1 = scmp.ne.s32.totalorder %s1566_s22, %s1562_s21 }
   0xd   : > { %p144_p2 = scmp.eq.s32.totalorder %s1192_s3, 3  ;;  %p149_p5 = scmp.ne.s32.totalorder %s1562_s21, %s1558_s20 }
   0xe   : > { %s2226_s29 = smov (%p33_p0, %s32_s29), 0  ;;  %s2228_s30 = smov (!%p33_p0, %s35_s30), %s1582_s26 }
   0xf   : > { %s129_s6 = ssub.s32 %s1578_s25, %s2226_s29  ;;  %p1681_p3 = por %p144_p2, %p143_p1 }
  0x10   : > { %p37_p4 = scmp.ge.s32.totalorder %s2228_s30, 2  ;;  %p150_p6 = scmp.eq.s32.totalorder %s1193_s28, 3 }
  0x11   : > { %p1196_p7 = scmp.ge.s32.totalorder %s1586_s27, 1  ;;  %p213_p9 = scmp.lt.s32.totalorder %s1586_s27, 5 }
  0x12   : > { %s2230_s30 = smov (%p37_p4, %s2228_s30), 0  ;;  %p1690_p8 = por %p150_p6, %p149_p5 }
  0x13   : > { %s128_s9 = ssub.s32 %s1582_s26, %s2230_s30  ;;  %s133_s10 = sadd.s32 1, %s1566_s22 }
  0x14   : > { %s130_s11 = sor.u32 %s129_s6, %s128_s9  ;;  %p214_p10 = pnand %p1196_p7, %p213_p9 }
  0x15   : > { %p131_p11 = scmp.eq.s32.totalorder %s130_s11, 0  ;;  %s1702_s13 = sand.u32 (!%p214_p10), 1, %s1562_s21  }
  0x16   : > { %217 = sbr.rel (%p214_p10) target bundleno = 1235 (0x4d3), region = 36  ;;  %p246_p12 = scmp.lt.s32.totalorder (!%p214_p10), %s1574_s24, 1 }
  0x17   : > { %s1699_s12 = scalar_select %p131_p11, %s1566_s22, %s133_s10  }
  0x18   : > { %s1197_s14 = sshll.u32 (!%p214_p10), %s1702_s13, 4  ;;  %s1198_s15 = sshll.u32 (!%p214_p10), %s1702_s13, 8 }
  0x19   : > { %s2217_s0 = sld [smem:[#allocation10_spill]] (!%p214_p10)  ;;  %s1713_s28 = scalar_lea.vmem (!%p214_p10), [#allocation4], %s1197_s14 }
  0x1a   : > { %s1715_s6 = scalar_lea.vmem (!%p214_p10), [#allocation6], %s1198_s15  ;;  %p1201_p13 = scmp.ne.s32.totalorder (!%p214_p10), %s1570_s23, 0 }
  0x1d   : > { %s247_s16 = scalar_select %p246_p12, %s1574_s24, 1 }
  0x1e   : > { %255 = sbr.rel (%p1201_p13) target bundleno = 264 (0x108), region = 40  ;;  %v1588_v5 = vmov (!%p1201_p13), 0.0   ;;  %v1589_v7 = vmov (!%p1201_p13), 0   ;;  %v265_v8 = vld [vmem:[%s2210_s2] sm:$0xff] (!%p1201_p13)  ;;  %v267_v9 = vld [vmem:[%s2210_s2 + $0x10] sm:$0xff] (!%p1201_p13)  ;;  %vm295_vm0 = vcmask (!%p1201_p13), 130048  }
  0x1f   : > { %s1235_s17 = sshll.u32 %s247_s16, 5  ;;  %375 = vmatprep.mubr.f32.mxu0 (!%p1201_p13), %v1588_v5  ;;  %393 = vmatprep.mubr.f32.mxu1 (!%p1201_p13), %v1588_v5  ;;  %v260_v10 = vld [vmem:[%s2209_s1] sm:$0xff] (!%p1201_p13)  ;;  %v263_v11 = vld [vmem:[%s2209_s1 + $0x18] sm:$0xff] (!%p1201_p13)  ;;  %v266_v12 = vld [vmem:[%s2210_s2 + $0x8] sm:$0xff] (!%p1201_p13) }
  0x20   : > { %s1711_s3 = scalar_lea.vmem %s2217_s0, %s1235_s17  ;;  %1362 = vset.pattern.permute.xlu0 (!%p1201_p13), %v1589_v7  ;;  %1363 = vset.pattern.permute.xlu1 (!%p1201_p13), %v1589_v7  ;;  %v268_v13 = vld [vmem:[%s2210_s2 + $0x18] sm:$0xff] (!%p1201_p13)  ;;  %v261_v14 = vld [vmem:[%s2209_s1 + $0x8] sm:$0xff] (!%p1201_p13)  ;;  %v264_v15 = vld [vmem:[%s2209_s1 + $0x20] sm:$0xff] (!%p1201_p13) }
  0x21   : > { %v257_v0 = vld [vmem:[%s1711_s3 + $0x8] sm:$0xff] (!%p1201_p13)  ;;  %v259_v1 = vld [vmem:[%s1711_s3 + $0x18] sm:$0xff] (!%p1201_p13)  ;;  %v256_v2 = vld [vmem:[%s1711_s3] sm:$0xff] (!%p1201_p13)  ;;  %272 = vperm.xlu0 (!%p1201_p13), %1362, %v265_v8   ;;  %282 = vperm.xlu1 (!%p1201_p13), %1363, %v267_v9  }
  0x22   : > { %v1237_v3 = vpack.c.bf16 (!%p1201_p13), %v259_v1, %v257_v0  ;;  %v258_v4 = vld [vmem:[%s1711_s3 + $0x10] sm:$0xff] (!%p1201_p13)  ;;  %v269_v16 = vld [vmem:[%s2210_s2 + $0x20] sm:$0xff] (!%p1201_p13) }
  0x23   : > { %v1239_v6 = vpack.c.bf16 (!%p1201_p13), %v258_v4, %v256_v2  ;;  %v262_v17 = vld [vmem:[%s2209_s1 + $0x10] sm:$0xff] (!%p1201_p13) }
  0x24   : > { %1238 = vmatprep.subr.bf16.mxu0 (!%p1201_p13), %v1237_v3  ;;  %1277 = vmatprep.subr.bf16.mxu1 (!%p1201_p13), %v1237_v3 }
  0x25   : > { %1240 = vmatpush1.bf16.msra.mxu0 %v1239_v6  ;;  %1278 = vmatpush1.bf16.msra.mxu1 %v1239_v6 }
  0x26   : > { %277 = vperm.xlu0 %1362, %v266_v12   ;;  %287 = vperm.xlu1 %1363, %v268_v13  }
  0x28   : > { %1202 = vmatmul.mubr.msk.f32.vlgmr.msra.gmra.mrb[0].mxu0 %vm295_vm0, %v260_v10  ;;  %1205 = vmatmul.mubr.msk.f32.vlgmr.msra.gmra.mrb[0].mxu1 %vm295_vm0, %v263_v11 }
  0x29   : > { %381 = vmatprep.mubr.f32.mxu0 %v1588_v5  ;;  %399 = vmatprep.mubr.f32.mxu1 %v1588_v5 }
  0x2a   : > { %292 = vperm.xlu0 %1362, %v269_v16  }
  0x2c   : > { %1203 = vmatmul.mubr.msk.f32.gmra.mrb[2].mxu0 %vm295_vm0, %v261_v14  ;;  %1206 = vmatmul.mubr.msk.f32.gmra.mrb[2].mxu1 %vm295_vm0, %v264_v15 }
  0x2d   : > { %387 = vmatprep.mubr.f32.mxu0 %v1588_v5 }
  0x30   : > { %1204 = vmatmul.mubr.msk.f32.gmra.mrb[4].mxu0 %vm295_vm0, %v262_v17 }
  0xa0   : > { %v273_v18 = vpop.permute.xlu0 %272  ;;  %v283_v19 = vpop.permute.xlu1 %282 }
  0xa5   : > { %v278_v20 = vpop.permute.xlu0 %277  ;;  %v288_v21 = vpop.permute.xlu1 %287 }
  0xa9   : > { %v293_v30 = vpop.permute.xlu0 %292 }
  0xfb   : > { %v377_v22 = vpop.f32.mrb[0].mxu0  ;;  %v395_v23 = vpop.f32.mrb[0].mxu1 }
  0xfc   : > { %v378_v24 = vadd.f32 %v377_v22, %v273_v18  ;;  %v379_v25 = vpop.f32.mrb[1].mxu0  ;;  %v397_v26 = vpop.f32.mrb[1].mxu1  ;;  %v396_v27 = vadd.f32 %v395_v23, %v288_v21 }
  0xfd   : > { %v380_v28 = vadd.f32 %v379_v25, %v273_v18  ;;  %v398_v29 = vadd.f32 %v397_v26, %v288_v21 }
  0xfe   : > { %406 = vst [vmem:[#allocation2] sm:$0xff] %v378_v24  ;;  %412 = vst [vmem:[#allocation2 + $0x30] sm:$0xff] %v396_v27 }
  0xff   : > { %407 = vst [vmem:[#allocation2 + $0x8] sm:$0xff] %v380_v28  ;;  %413 = vst [vmem:[#allocation2 + $0x38] sm:$0xff] %v398_v29  ;;  %v383_v31 = vpop.f32.mrb[2].mxu0  ;;  %v401_v32 = vpop.f32.mrb[2].mxu1 }
 0x100   : > { %v384_v33 = vadd.f32 %v383_v31, %v278_v20  ;;  %v402_v34 = vadd.f32 %v401_v32, %v293_v30  ;;  %v385_v35 = vpop.f32.mrb[3].mxu0  ;;  %v403_v36 = vpop.f32.mrb[3].mxu1 }
 0x101   : > { %v386_v37 = vadd.f32 %v385_v35, %v278_v20  ;;  %v404_v38 = vadd.f32 %v403_v36, %v293_v30 }
 0x102   : > { %408 = vst [vmem:[#allocation2 + $0x10] sm:$0xff] %v384_v33  ;;  %414 = vst [vmem:[#allocation2 + $0x40] sm:$0xff] %v402_v34 }
 0x103   : > { %409 = vst [vmem:[#allocation2 + $0x18] sm:$0xff] %v386_v37  ;;  %415 = vst [vmem:[#allocation2 + $0x48] sm:$0xff] %v404_v38  ;;  %v389_v39 = vpop.f32.mrb[4].mxu0 }
 0x104   : > { %v390_v40 = vadd.f32 %v389_v39, %v283_v19  ;;  %v391_v41 = vpop.f32.mrb[5].mxu0 }
 0x105   : > { %v392_v42 = vadd.f32 %v391_v41, %v283_v19 }
 0x106   : > { %410 = vst [vmem:[#allocation2 + $0x20] sm:$0xff] %v390_v40 }
 0x107   : > { %411 = vst [vmem:[#allocation2 + $0x28] sm:$0xff] %v392_v42 }
 0x108 PF: > { %s1207_s11 = sshll.u32 %s1570_s23, 7  ;;  %v424_v43 = vld [vmem:[#allocation2 + $0x8] sm:$0xff]  ;;  %v423_v45 = vld [vmem:[#allocation2] sm:$0xff]  ;;  %v1590_v48 = vmov 0.0   ;;  %vm472_vm1 = vcmask 130048   ;;  %v430_v4 = vlaneseq  ;;  %s1231_s17 = sshll.u32 %s1574_s24, 6 }
 0x109   : > { %s417_s14 = sshra.s32 %s1207_s11, 7  ;;  %v425_v47 = vld [vmem:[#allocation2 + $0x10] sm:$0xff]  ;;  %585 = vmatprep.mubr.f32.mxu0 %v1590_v48  ;;  %s1080_s9 = sshll.u32 %s1715_s6, 4  ;;  %s2113_s9 = int_to_ptr.vmem [resolvable:$true] %s1080_s9 }
 0x10a   : > { %v426_v44 = vld [vmem:[#allocation2 + $0x18] sm:$0xff]  ;;  %s1208_s15 = sshll.u32 %s417_s14, 3  ;;  %v1243_v49 = vpack.c.bf16 %v425_v47, %v423_v45  ;;  %v431_v5 = vshrl.u32 %v430_v4, 7  ;;  %v428_v7 = vld [vmem:[#allocation2 + $0x40] ss:$8 sm:$0x3] }
 0x10b   : > { %v1241_v46 = vpack.c.bf16 %v426_v44, %v424_v43  ;;  %s420_s16 = scalar_lea.vmem %s1711_s3, %s1208_s15  ;;  %s1236_s3 = sshll.u32 %s1570_s23, 5 }
 0x10c   : > { %v1759_v50 = vld [vmem:[%s420_s16] sm:$0xff]  ;;  %v1762_v51 = vld [vmem:[%s420_s16 + $0x10] sm:$0xff]  ;;  %v432_v6 = vsub.s32 0, %v431_v5  ;;  %v436_v8 = vsub.s32 1, %v431_v5  ;;  %s1077_s18 = sadd.s32 %s1236_s3, %s1231_s17  ;;  %s1047_s15 = scalar_lea.sflag [#allocation7], %s1702_s13 }
 0x10d   : > { %1242 = vmatprep.subr.bf16.mxu0 %v1241_v46  ;;  %440 = vxpose.xlu0.b32.start [1/2] (short) %v1759_v50, 128  ;;  %s1232_s19 = sshll.u32 %s1077_s18, 7  ;;  %s1460_s16 = scalar_lea.vmem %s2113_s9, 4096 }
 0x10e   : > { %1244 = vmatpush1.bf16.msra.mxu0 %v1243_v49  ;;  %v1781_v9 = vrot.slane %v428_v7, %v432_v6  ;;  %v1783_v10 = vrot.slane %v428_v7, %v436_v8  ;;  %s2111_s14 = scalar_lea.hbm %s2213_s5, %s1232_s19  ;;  %p1461_p0 = scmp.ne.s32.totalorder %s2113_s9, %s1460_s16 }
 0x10f   : > { %s1591_s0 = smov [#allocation6]  }
 0x110   : > { %p1462_p1 = pnand %p1461_p0, %p1681_p3  ;;  %s1464_s3 = sshll.u32 %s1591_s0, 4  ;;  %s1465_s3 = int_to_ptr.vmem [resolvable:$false] %s1464_s3 }
 0x111   : > { %441 = vxpose.xlu0.b32.end [2/2] (short) %v1762_v51, 128  ;;  %p1467_p4 = scmp.lt.s32.totalorder %s2113_s9, %s1465_s3 }
 0x112   : > { %p1463_p2 = pneg %p1462_p1 }
 0x18d   : > { %v456_v52 = vpop.trf.xlu0 }
 0x18e   : > { %1209 = vmatmul.mubr.msk.f32.vlgmr.msra.gmra.mrb[0].mxu0 %vm472_vm1, %v456_v52 }
 0x18f   : > { %591 = vmatprep.mubr.f32.mxu0 %v1590_v48 }
 0x191   : > { %v457_v53 = vpop.trf.xlu0 }
 0x192   : > { %1210 = vmatmul.mubr.msk.f32.gmra.mrb[2].mxu0 %vm472_vm1, %v457_v53 }
 0x193   : > { %597 = vmatprep.mubr.f32.mxu0 %v1590_v48 }
 0x195   : > { %v458_v54 = vpop.trf.xlu0 }
 0x196   : > { %1211 = vmatmul.mubr.msk.f32.gmra.mrb[4].mxu0 %vm472_vm1, %v458_v54 }
 0x197   : > { %603 = vmatprep.mubr.f32.mxu0 %v1590_v48 }
 0x199   : > { %v459_v55 = vpop.trf.xlu0 }
 0x19a   : > { %1212 = vmatmul.mubr.msk.f32.gmra.mrb[6].mxu0 %vm472_vm1, %v459_v55 }
 0x19b   : > { %609 = vmatprep.mubr.f32.mxu0 %v1590_v48 }
 0x19d   : > { %v460_v56 = vpop.trf.xlu0 }
 0x19e   : > { %1213 = vmatmul.mubr.msk.f32.gmra.mrb[8].mxu0 %vm472_vm1, %v460_v56 }
 0x19f   : > { %615 = vmatprep.mubr.f32.mxu0 %v1590_v48 }
 0x1a1   : > { %v461_v57 = vpop.trf.xlu0 }
 0x1a2   : > { %1214 = vmatmul.mubr.msk.f32.gmra.mrb[10].mxu0 %vm472_vm1, %v461_v57 }
 0x1a3   : > { %621 = vmatprep.mubr.f32.mxu0 %v1590_v48 }
 0x1a5   : > { %v462_v58 = vpop.trf.xlu0 }
 0x1a6   : > { %1215 = vmatmul.mubr.msk.f32.gmra.mrb[12].mxu0 %vm472_vm1, %v462_v58 }
 0x1a7   : > { %627 = vmatprep.mubr.f32.mxu0 %v1590_v48 }
 0x1a9   : > { %v463_v59 = vpop.trf.xlu0 }
 0x1aa   : > { %1216 = vmatmul.mubr.msk.f32.gmra.mrb[14].mxu0 %vm472_vm1, %v463_v59 }
 0x1ab   : > { %633 = vmatprep.mubr.f32.mxu0 %v1590_v48 }
 0x1ad   : > { %v464_v60 = vpop.trf.xlu0 }
 0x1ae   : > { %1217 = vmatmul.mubr.msk.f32.gmra.mrb[16].mxu0 %vm472_vm1, %v464_v60 }
 0x1af   : > { %639 = vmatprep.mubr.f32.mxu0 %v1590_v48 }
 0x1b1   : > { %v465_v61 = vpop.trf.xlu0 }
 0x1b2   : > { %1218 = vmatmul.mubr.msk.f32.gmra.mrb[18].mxu0 %vm472_vm1, %v465_v61 }
 0x1b3   : > { %645 = vmatprep.mubr.f32.mxu0 %v1590_v48 }
 0x1b5   : > { %v466_v62 = vpop.trf.xlu0 }
 0x1b6   : > { %1219 = vmatmul.mubr.msk.f32.gmra.mrb[20].mxu0 %vm472_vm1, %v466_v62 }
 0x1b7   : > { %651 = vmatprep.mubr.f32.mxu0 %v1590_v48 }
 0x1b9   : > { %v467_v63 = vpop.trf.xlu0 }
 0x1ba   : > { %1220 = vmatmul.mubr.msk.f32.gmra.mrb[22].mxu0 %vm472_vm1, %v467_v63 }
 0x1bb   : > { %657 = vmatprep.mubr.f32.mxu0 %v1590_v48 }
 0x1bd   : > { %v468_v0 = vpop.trf.xlu0 }
 0x1be   : > { %1221 = vmatmul.mubr.msk.f32.gmra.mrb[24].mxu0 %vm472_vm1, %v468_v0 }
 0x1bf   : > { %663 = vmatprep.mubr.f32.mxu0 %v1590_v48 }
 0x1c1   : > { %v469_v1 = vpop.trf.xlu0 }
 0x1c2   : > { %1222 = vmatmul.mubr.msk.f32.gmra.mrb[26].mxu0 %vm472_vm1, %v469_v1 }
 0x1c3   : > { %669 = vmatprep.mubr.f32.mxu0 %v1590_v48 }
 0x1c5   : > { %v470_v2 = vpop.trf.xlu0 }
 0x1c6   : > { %1223 = vmatmul.mubr.msk.f32.gmra.mrb[28].mxu0 %vm472_vm1, %v470_v2 }
 0x1c7   : > { %675 = vmatprep.mubr.f32.mxu0 %v1590_v48 }
 0x1c9   : > { %v471_v3 = vpop.trf.xlu0 }
 0x1ca   : > { %1224 = vmatmul.mubr.msk.f32.gmra.mrb[30].mxu0 %vm472_vm1, %v471_v3 }
 0x261   : > { %v587_v11 = vpop.f32.mrb[0].mxu0 }
 0x262   : > { %v1786_v12 = vadd.f32 %v587_v11, %v1781_v9  ;;  %v589_v13 = vpop.f32.mrb[1].mxu0 }
 0x263   : > { %v1789_v14 = vadd.f32 %v589_v13, %v1783_v10 }
 0x265   : > { %v593_v15 = vpop.f32.mrb[2].mxu0  ;;  %v682_v16 = vmax.f32 %v1786_v12, %v1789_v14 }
 0x266   : > { %v1794_v17 = vadd.f32 %v593_v15, %v1781_v9  ;;  %v595_v18 = vpop.f32.mrb[3].mxu0 }
 0x267   : > { %v1797_v19 = vadd.f32 %v595_v18, %v1783_v10  ;;  %683 = vmax.xlane.f32.xlu1 %v682_v16 }
 0x269   : > { %v599_v20 = vpop.f32.mrb[4].mxu0  ;;  %v685_v21 = vmax.f32 %v1794_v17, %v1797_v19 }
 0x26a   : > { %v1802_v22 = vadd.f32 %v599_v20, %v1781_v9  ;;  %v601_v23 = vpop.f32.mrb[5].mxu0 }
 0x26b   : > { %v1805_v24 = vadd.f32 %v601_v23, %v1783_v10  ;;  %686 = vmax.xlane.f32.xlu1 %v685_v21 }
 0x26d   : > { %v605_v25 = vpop.f32.mrb[6].mxu0  ;;  %v688_v26 = vmax.f32 %v1802_v22, %v1805_v24 }
 0x26e   : > { %v1810_v27 = vadd.f32 %v605_v25, %v1781_v9  ;;  %v607_v28 = vpop.f32.mrb[7].mxu0 }
 0x26f   : > { %v1813_v29 = vadd.f32 %v607_v28, %v1783_v10  ;;  %689 = vmax.xlane.f32.xlu0 %v688_v26 }
 0x271   : > { %v611_v30 = vpop.f32.mrb[8].mxu0  ;;  %v691_v31 = vmax.f32 %v1810_v27, %v1813_v29 }
 0x272   : > { %v1818_v32 = vadd.f32 %v611_v30, %v1781_v9  ;;  %v613_v33 = vpop.f32.mrb[9].mxu0 }
 0x273   : > { %v1821_v34 = vadd.f32 %v613_v33, %v1783_v10  ;;  %692 = vmax.xlane.f32.xlu1 %v691_v31 }
 0x275   : > { %v617_v35 = vpop.f32.mrb[10].mxu0  ;;  %v694_v36 = vmax.f32 %v1818_v32, %v1821_v34 }
 0x276   : > { %v1826_v37 = vadd.f32 %v617_v35, %v1781_v9  ;;  %v619_v38 = vpop.f32.mrb[11].mxu0 }
 0x277   : > { %v1829_v39 = vadd.f32 %v619_v38, %v1783_v10  ;;  %695 = vmax.xlane.f32.xlu1 %v694_v36 }
 0x279   : > { %v623_v40 = vpop.f32.mrb[12].mxu0  ;;  %v697_v41 = vmax.f32 %v1826_v37, %v1829_v39 }
 0x27a   : > { %v1834_v42 = vadd.f32 %v623_v40, %v1781_v9  ;;  %v625_v43 = vpop.f32.mrb[13].mxu0 }
 0x27b   : > { %v1837_v44 = vadd.f32 %v625_v43, %v1783_v10  ;;  %698 = vmax.xlane.f32.xlu1 %v697_v41 }
 0x27d   : > { %v629_v45 = vpop.f32.mrb[14].mxu0  ;;  %v700_v46 = vmax.f32 %v1834_v42, %v1837_v44 }
 0x27e   : > { %v1842_v47 = vadd.f32 %v629_v45, %v1781_v9  ;;  %v631_v48 = vpop.f32.mrb[15].mxu0 }
 0x27f   : > { %v1845_v49 = vadd.f32 %v631_v48, %v1783_v10  ;;  %701 = vmax.xlane.f32.xlu1 %v700_v46 }
 0x281   : > { %v635_v52 = vpop.f32.mrb[16].mxu0  ;;  %v703_v53 = vmax.f32 %v1842_v47, %v1845_v49 }
 0x282   : > { %v1850_v54 = vadd.f32 %v635_v52, %v1781_v9  ;;  %v637_v55 = vpop.f32.mrb[17].mxu0 }
 0x283   : > { %v1853_v56 = vadd.f32 %v637_v55, %v1783_v10  ;;  %704 = vmax.xlane.f32.xlu1 %v703_v53 }
 0x285   : > { %v641_v57 = vpop.f32.mrb[18].mxu0  ;;  %v706_v58 = vmax.f32 %v1850_v54, %v1853_v56 }
 0x286   : > { %v1858_v59 = vadd.f32 %v641_v57, %v1781_v9  ;;  %v643_v60 = vpop.f32.mrb[19].mxu0 }
 0x287   : > { %v1861_v61 = vadd.f32 %v643_v60, %v1783_v10  ;;  %707 = vmax.xlane.f32.xlu1 %v706_v58 }
 0x289   : > { %v647_v62 = vpop.f32.mrb[20].mxu0  ;;  %v709_v63 = vmax.f32 %v1858_v59, %v1861_v61 }
 0x28a   : > { %v1866_v0 = vadd.f32 %v647_v62, %v1781_v9  ;;  %v649_v1 = vpop.f32.mrb[21].mxu0 }
 0x28b   : > { %v1869_v2 = vadd.f32 %v649_v1, %v1783_v10  ;;  %710 = vmax.xlane.f32.xlu1 %v709_v63 }
 0x28d   : > { %v653_v3 = vpop.f32.mrb[22].mxu0  ;;  %v712_v4 = vmax.f32 %v1866_v0, %v1869_v2 }
 0x28e   : > { %v1874_v5 = vadd.f32 %v653_v3, %v1781_v9  ;;  %v655_v6 = vpop.f32.mrb[23].mxu0 }
 0x28f   : > { %v1877_v7 = vadd.f32 %v655_v6, %v1783_v10  ;;  %713 = vmax.xlane.f32.xlu1 %v712_v4 }
 0x291   : > { %v659_v8 = vpop.f32.mrb[24].mxu0  ;;  %v715_v11 = vmax.f32 %v1874_v5, %v1877_v7 }
 0x292   : > { %v1882_v13 = vadd.f32 %v659_v8, %v1781_v9  ;;  %v661_v15 = vpop.f32.mrb[25].mxu0 }
 0x293   : > { %v1885_v16 = vadd.f32 %v661_v15, %v1783_v10  ;;  %716 = vmax.xlane.f32.xlu1 %v715_v11 }
 0x295   : > { %v665_v18 = vpop.f32.mrb[26].mxu0  ;;  %v718_v20 = vmax.f32 %v1882_v13, %v1885_v16 }
 0x296   : > { %v1890_v21 = vadd.f32 %v665_v18, %v1781_v9  ;;  %v667_v23 = vpop.f32.mrb[27].mxu0 }
 0x297   : > { %v1893_v25 = vadd.f32 %v667_v23, %v1783_v10  ;;  %719 = vmax.xlane.f32.xlu1 %v718_v20 }
 0x299   : > { %v671_v26 = vpop.f32.mrb[28].mxu0  ;;  %v721_v28 = vmax.f32 %v1890_v21, %v1893_v25 }
 0x29a   : > { %v1898_v30 = vadd.f32 %v671_v26, %v1781_v9  ;;  %v673_v31 = vpop.f32.mrb[29].mxu0 }
 0x29b   : > { %v1901_v33 = vadd.f32 %v673_v31, %v1783_v10  ;;  %722 = vmax.xlane.f32.xlu1 %v721_v28 }
 0x29d   : > { %v677_v35 = vpop.f32.mrb[30].mxu0  ;;  %v724_v36 = vmax.f32 %v1898_v30, %v1901_v33 }
 0x29e   : > { %v1906_v38 = vadd.f32 %v677_v35, %v1781_v9  ;;  %v679_v40 = vpop.f32.mrb[31].mxu0 }
 0x29f   : > { %v1909_v41 = vadd.f32 %v679_v40, %v1783_v10  ;;  %725 = vmax.xlane.f32.xlu1 %v724_v36 }
 0x2a1   : > { %v727_v43 = vmax.f32 %v1906_v38, %v1909_v41 }
 0x2a3   : > { %728 = vmax.xlane.f32.xlu1 %v727_v43 }
 0x2f4   : > { %v684_v45 = vpop.xlane.xlu1 %683 }
 0x2f5   : > { %v730_v46 = vsub.f32 %v1786_v12, %v684_v45  ;;  %v731_v48 = vsub.f32 %v1789_v14, %v684_v45 }
 0x2f7   : > { %v762_v52 = vmul.f32 1.442695, %v730_v46  ;;  %v764_v53 = vmul.f32 1.442695, %v731_v48 }
 0x2f8   : > { %v687_v55 = vpop.xlane.xlu1 %686 }
 0x2f9   : > { %1364 = vpow2.f32 %v762_v52  ;;  %v732_v9 = vsub.f32 %v1794_v17, %v687_v55  ;;  %v733_v57 = vsub.f32 %v1797_v19, %v687_v55 }
 0x2fa   : > { %1366 = vpow2.f32 %v764_v53 }
 0x2fb   : > { %v766_v10 = vmul.f32 1.442695, %v732_v9  ;;  %v768_v58 = vmul.f32 1.442695, %v733_v57 }
 0x2fc   : > { %v690_v60 = vpop.xlane.xlu0 %689 }
 0x2fd   : > { %1368 = vpow2.f32 %v766_v10  ;;  %v734_v62 = vsub.f32 %v1802_v22, %v690_v60  ;;  %v735_v63 = vsub.f32 %v1805_v24, %v690_v60 }
 0x2fe   : > { %1370 = vpow2.f32 %v768_v58 }
 0x2ff   : > { %v770_v12 = vmul.f32 1.442695, %v734_v62  ;;  %v772_v14 = vmul.f32 1.442695, %v735_v63 }
 0x300   : > { %v693_v1 = vpop.xlane.xlu1 %692 }
 0x301   : > { %1372 = vpow2.f32 %v770_v12  ;;  %v736_v3 = vsub.f32 %v1810_v27, %v693_v1  ;;  %v737_v17 = vsub.f32 %v1813_v29, %v693_v1 }
 0x302   : > { %1374 = vpow2.f32 %v772_v14 }
 0x303   : > { %v1921_v19 = vpop.eup %1364  ;;  %v774_v4 = vmul.f32 1.442695, %v736_v3  ;;  %v776_v6 = vmul.f32 1.442695, %v737_v17 }
 0x304   : > { %v1923_v8 = vpop.eup %1366  ;;  %v696_v11 = vpop.xlane.xlu1 %695 }
 0x305   : > { %1376 = vpow2.f32 %v774_v4  ;;  %v738_v22 = vsub.f32 %v1818_v32, %v696_v11  ;;  %v739_v24 = vsub.f32 %v1821_v34, %v696_v11  ;;  %v826_v15 = vadd.f32 %v1923_v8, %v1921_v19 }
 0x306   : > { %1378 = vpow2.f32 %v776_v6 }
 0x307   : > { %v1929_v27 = vpop.eup %1368  ;;  %v778_v29 = vmul.f32 1.442695, %v738_v22  ;;  %v780_v18 = vmul.f32 1.442695, %v739_v24  ;;  %827 = vadd.xlane.f32.xlu1 %v826_v15 }
 0x308   : > { %v1931_v20 = vpop.eup %1370  ;;  %v699_v23 = vpop.xlane.xlu1 %698 }
 0x309   : > { %1380 = vpow2.f32 %v778_v29  ;;  %v740_v26 = vsub.f32 %v1826_v37, %v699_v23  ;;  %v741_v28 = vsub.f32 %v1829_v39, %v699_v23  ;;  %v829_v32 = vadd.f32 %v1931_v20, %v1929_v27 }
 0x30a   : > { %1382 = vpow2.f32 %v780_v18 }
 0x30b   : > { %v1937_v34 = vpop.eup %1372  ;;  %v782_v31 = vmul.f32 1.442695, %v740_v26  ;;  %v784_v35 = vmul.f32 1.442695, %v741_v28  ;;  %830 = vadd.xlane.f32.xlu1 %v829_v32 }
 0x30c   : > { %v1939_v36 = vpop.eup %1374  ;;  %v702_v40 = vpop.xlane.xlu1 %701 }
 0x30d   : > { %1384 = vpow2.f32 %v782_v31  ;;  %v742_v43 = vsub.f32 %v1834_v42, %v702_v40  ;;  %v743_v45 = vsub.f32 %v1837_v44, %v702_v40  ;;  %v832_v37 = vadd.f32 %v1939_v36, %v1937_v34 }
 0x30e   : > { %1386 = vpow2.f32 %v784_v35 }
 0x30f   : > { %v1945_v39 = vpop.eup %1376  ;;  %v786_v46 = vmul.f32 1.442695, %v742_v43  ;;  %v788_v48 = vmul.f32 1.442695, %v743_v45  ;;  %833 = vadd.xlane.f32.xlu1 %v832_v37 }
 0x310   : > { %v1947_v52 = vpop.eup %1378  ;;  %v705_v53 = vpop.xlane.xlu1 %704 }
 0x311   : > { %1388 = vpow2.f32 %v786_v46  ;;  %v744_v55 = vsub.f32 %v1842_v47, %v705_v53  ;;  %v745_v9 = vsub.f32 %v1845_v49, %v705_v53  ;;  %v835_v42 = vadd.f32 %v1947_v52, %v1945_v39 }
 0x312   : > { %1390 = vpow2.f32 %v788_v48 }
 0x313   : > { %v1953_v44 = vpop.eup %1380  ;;  %v790_v57 = vmul.f32 1.442695, %v744_v55  ;;  %v792_v10 = vmul.f32 1.442695, %v745_v9  ;;  %836 = vadd.xlane.f32.xlu1 %v835_v42 }
 0x314   : > { %v1955_v58 = vpop.eup %1382  ;;  %v708_v60 = vpop.xlane.xlu1 %707 }
 0x315   : > { %1392 = vpow2.f32 %v790_v57  ;;  %v746_v62 = vsub.f32 %v1850_v54, %v708_v60  ;;  %v747_v63 = vsub.f32 %v1853_v56, %v708_v60  ;;  %v838_v47 = vadd.f32 %v1955_v58, %v1953_v44 }
 0x316   : > { %1394 = vpow2.f32 %v792_v10 }
 0x317   : > { %v1961_v49 = vpop.eup %1384  ;;  %v794_v12 = vmul.f32 1.442695, %v746_v62  ;;  %v796_v14 = vmul.f32 1.442695, %v747_v63  ;;  %839 = vadd.xlane.f32.xlu1 %v838_v47 }
 0x318   : > { %v1963_v1 = vpop.eup %1386  ;;  %v711_v3 = vpop.xlane.xlu1 %710 }
 0x319   : > { %1396 = vpow2.f32 %v794_v12  ;;  %v748_v17 = vsub.f32 %v1858_v59, %v711_v3  ;;  %v749_v4 = vsub.f32 %v1861_v61, %v711_v3  ;;  %v841_v54 = vadd.f32 %v1963_v1, %v1961_v49 }
 0x31a   : > { %1398 = vpow2.f32 %v796_v14 }
 0x31b   : > { %v1969_v56 = vpop.eup %1388  ;;  %v798_v6 = vmul.f32 1.442695, %v748_v17  ;;  %v800_v11 = vmul.f32 1.442695, %v749_v4  ;;  %842 = vadd.xlane.f32.xlu1 %v841_v54 }
 0x31c   : > { %v1971_v22 = vpop.eup %1390  ;;  %v714_v24 = vpop.xlane.xlu1 %713 }
 0x31d   : > { %1400 = vpow2.f32 %v798_v6  ;;  %v750_v15 = vsub.f32 %v1866_v0, %v714_v24  ;;  %v751_v29 = vsub.f32 %v1869_v2, %v714_v24  ;;  %v844_v59 = vadd.f32 %v1971_v22, %v1969_v56 }
 0x31e   : > { %1402 = vpow2.f32 %v800_v11 }
 0x31f   : > { %v1977_v61 = vpop.eup %1392  ;;  %v802_v18 = vmul.f32 1.442695, %v750_v15  ;;  %v804_v23 = vmul.f32 1.442695, %v751_v29  ;;  %845 = vadd.xlane.f32.xlu1 %v844_v59 }
 0x320   : > { %v1979_v26 = vpop.eup %1394  ;;  %v717_v28 = vpop.xlane.xlu1 %716 }
 0x321   : > { %1404 = vpow2.f32 %v802_v18  ;;  %v752_v32 = vsub.f32 %v1874_v5, %v717_v28  ;;  %v753_v31 = vsub.f32 %v1877_v7, %v717_v28  ;;  %v847_v0 = vadd.f32 %v1979_v26, %v1977_v61 }
 0x322   : > { %1406 = vpow2.f32 %v804_v23 }
 0x323   : > { %v1985_v2 = vpop.eup %1396  ;;  %v806_v35 = vmul.f32 1.442695, %v752_v32  ;;  %v808_v40 = vmul.f32 1.442695, %v753_v31  ;;  %848 = vadd.xlane.f32.xlu1 %v847_v0 }
 0x324   : > { %v1987_v43 = vpop.eup %1398  ;;  %v720_v45 = vpop.xlane.xlu1 %719 }
 0x325   : > { %1408 = vpow2.f32 %v806_v35  ;;  %v754_v37 = vsub.f32 %v1882_v13, %v720_v45  ;;  %v755_v46 = vsub.f32 %v1885_v16, %v720_v45  ;;  %v850_v5 = vadd.f32 %v1987_v43, %v1985_v2  ;;  %v955_v35 = vld [vmem:[#allocation2 + $0x28] sm:$0xff] }
 0x326   : > { %1410 = vpow2.f32 %v808_v40  ;;  %1022 = vmatprep.mubr.f32.mxu1 %v955_v35 }
 0x327   : > { %v1993_v7 = vpop.eup %1400  ;;  %v810_v48 = vmul.f32 1.442695, %v754_v37  ;;  %v812_v53 = vmul.f32 1.442695, %v755_v46  ;;  %851 = vadd.xlane.f32.xlu1 %v850_v5 }
 0x328   : > { %v1995_v55 = vpop.eup %1402  ;;  %v723_v9 = vpop.xlane.xlu1 %722 }
 0x329   : > { %1412 = vpow2.f32 %v810_v48  ;;  %v756_v42 = vsub.f32 %v1890_v21, %v723_v9  ;;  %v757_v57 = vsub.f32 %v1893_v25, %v723_v9  ;;  %v853_v13 = vadd.f32 %v1995_v55, %v1993_v7 }
 0x32a   : > { %1414 = vpow2.f32 %v812_v53 }
 0x32b   : > { %v2001_v16 = vpop.eup %1404  ;;  %v814_v10 = vmul.f32 1.442695, %v756_v42  ;;  %v816_v60 = vmul.f32 1.442695, %v757_v57  ;;  %854 = vadd.xlane.f32.xlu1 %v853_v13 }
 0x32c   : > { %v2003_v62 = vpop.eup %1406  ;;  %v726_v63 = vpop.xlane.xlu1 %725 }
 0x32d   : > { %1416 = vpow2.f32 %v814_v10  ;;  %v758_v47 = vsub.f32 %v1898_v30, %v726_v63  ;;  %v759_v12 = vsub.f32 %v1901_v33, %v726_v63  ;;  %v856_v21 = vadd.f32 %v2003_v62, %v2001_v16 }
 0x32e   : > { %1418 = vpow2.f32 %v816_v60 }
 0x32f   : > { %v2009_v25 = vpop.eup %1408  ;;  %v818_v14 = vmul.f32 1.442695, %v758_v47  ;;  %v820_v3 = vmul.f32 1.442695, %v759_v12  ;;  %857 = vadd.xlane.f32.xlu1 %v856_v21 }
 0x330   : > { %v2011_v17 = vpop.eup %1410  ;;  %v729_v4 = vpop.xlane.xlu1 %728 }
 0x331   : > { %1420 = vpow2.f32 %v818_v14  ;;  %v760_v54 = vsub.f32 %v1906_v38, %v729_v4  ;;  %v761_v6 = vsub.f32 %v1909_v41, %v729_v4  ;;  %v859_v30 = vadd.f32 %v2011_v17, %v2009_v25 }
 0x332   : > { %1422 = vpow2.f32 %v820_v3 }
 0x333   : > { %v2017_v33 = vpop.eup %1412  ;;  %v822_v11 = vmul.f32 1.442695, %v760_v54  ;;  %v824_v24 = vmul.f32 1.442695, %v761_v6  ;;  %860 = vadd.xlane.f32.xlu1 %v859_v30 }
 0x334   : > { %v2019_v15 = vpop.eup %1414 }
 0x335   : > { %1424 = vpow2.f32 %v822_v11  ;;  %v862_v29 = vadd.f32 %v2019_v15, %v2017_v33 }
 0x336   : > { %1426 = vpow2.f32 %v824_v24 }
 0x337   : > { %v2023_v59 = vpop.eup %1416  ;;  %863 = vadd.xlane.f32.xlu1 %v862_v29 }
 0x338   : > { %v2025_v38 = vpop.eup %1418 }
 0x339   : > { %v865_v41 = vadd.f32 %v2025_v38, %v2023_v59 }
 0x33b   : > { %v2029_v18 = vpop.eup %1420  ;;  %866 = vadd.xlane.f32.xlu0 %v865_v41 }
 0x33c   : > { %v2031_v23 = vpop.eup %1422 }
 0x33d   : > { %v868_v28 = vadd.f32 %v2031_v23, %v2029_v18 }
 0x33f   : > { %v2035_v32 = vpop.eup %1424  ;;  %869 = vadd.xlane.f32.xlu1 %v868_v28 }
 0x340   : > { %v2037_v31 = vpop.eup %1426 }
 0x341   : > { %v871_v0 = vadd.f32 %v2037_v31, %v2035_v32 }
 0x343   : > { %872 = vadd.xlane.f32.xlu0 %v871_v0 }
 0x394   : > { %v828_v40 = vpop.xlane.xlu1 %827 }
 0x395   : > { %1428 = vrcp.f32 %v828_v40 }
 0x398   : > { %v831_v45 = vpop.xlane.xlu1 %830 }
 0x399   : > { %1430 = vrcp.f32 %v831_v45 }
 0x39c   : > { %v834_v37 = vpop.xlane.xlu1 %833 }
 0x39d   : > { %1432 = vrcp.f32 %v834_v37 }
 0x39f   : > { %v1429_v46 = vpop.eup %1428 }
 0x3a0   : > { %v837_v5 = vpop.xlane.xlu1 %836  ;;  %v891_v48 = vmul.f32 %v1429_v46, %v1923_v8  ;;  %v890_v53 = vmul.f32 %v1429_v46, %v1921_v19 }
 0x3a1   : > { %1434 = vrcp.f32 %v837_v5 }
 0x3a2   : > { %923 = vst [vmem:[%s1715_s6 + $0x8] sm:$0xff] %v891_v48  ;;  %922 = vst [vmem:[%s1715_s6] sm:$0xff] %v890_v53 }
 0x3a3   : > { %v1431_v9 = vpop.eup %1430 }
 0x3a4   : > { %v840_v42 = vpop.xlane.xlu1 %839  ;;  %v893_v57 = vmul.f32 %v1431_v9, %v1931_v20  ;;  %v892_v13 = vmul.f32 %v1431_v9, %v1929_v27 }
 0x3a5   : > { %1436 = vrcp.f32 %v840_v42 }
 0x3a6   : > { %925 = vst [vmem:[%s1715_s6 + $0x18] sm:$0xff] %v893_v57  ;;  %v1245_v10 = vpack.c.bf16 %v893_v57, %v891_v48  ;;  %924 = vst [vmem:[%s1715_s6 + $0x10] sm:$0xff] %v892_v13  ;;  %v1247_v60 = vpack.c.bf16 %v892_v13, %v890_v53 }
 0x3a7   : > { %v1433_v8 = vpop.eup %1432 }
 0x3a8   : > { %1246 = vmatprep.subr.bf16.mxu1 %v1245_v10  ;;  %v843_v19 = vpop.xlane.xlu1 %842  ;;  %v895_v63 = vmul.f32 %v1433_v8, %v1939_v36  ;;  %v894_v47 = vmul.f32 %v1433_v8, %v1937_v34 }
 0x3a9   : > { %1438 = vrcp.f32 %v843_v19  ;;  %1248 = vmatpush1.bf16.xpose.msra.mxu1 %v1247_v60 }
 0x3aa   : > { %927 = vst [vmem:[%s1715_s6 + $0x28] sm:$0xff] %v895_v63  ;;  %926 = vst [vmem:[%s1715_s6 + $0x20] sm:$0xff] %v894_v47 }
 0x3ab   : > { %v1435_v20 = vpop.eup %1434 }
 0x3ac   : > { %v846_v27 = vpop.xlane.xlu1 %845  ;;  %v897_v12 = vmul.f32 %v1435_v20, %v1947_v52  ;;  %v896_v21 = vmul.f32 %v1435_v20, %v1945_v39 }
 0x3ad   : > { %1440 = vrcp.f32 %v846_v27 }
 0x3ae   : > { %929 = vst [vmem:[%s1715_s6 + $0x38] sm:$0xff] %v897_v12  ;;  %v1249_v14 = vpack.c.bf16 %v897_v12, %v895_v63  ;;  %928 = vst [vmem:[%s1715_s6 + $0x30] sm:$0xff] %v896_v21  ;;  %v1251_v36 = vpack.c.bf16 %v896_v21, %v894_v47 }
 0x3af   : > { %v1437_v3 = vpop.eup %1436 }
 0x3b0   : > { %1250 = vmatprep.subr.bf16.mxu1 %v1249_v14  ;;  %v849_v34 = vpop.xlane.xlu1 %848  ;;  %v899_v4 = vmul.f32 %v1437_v3, %v1955_v58  ;;  %v898_v54 = vmul.f32 %v1437_v3, %v1953_v44 }
 0x3b1   : > { %1442 = vrcp.f32 %v849_v34  ;;  %1252 = vmatpush1.bf16.xpose.msra.mxu1 %v1251_v36  ;;  %v956_v36 = vld [vmem:[#allocation2 + $0x30] sm:$0xff] }
 0x3b2   : > { %931 = vst [vmem:[%s1715_s6 + $0x48] sm:$0xff] %v899_v4  ;;  %930 = vst [vmem:[%s1715_s6 + $0x40] sm:$0xff] %v898_v54 }
 0x3b3   : > { %v1439_v52 = vpop.eup %1438 }
 0x3b4   : > { %v852_v39 = vpop.xlane.xlu1 %851  ;;  %v901_v6 = vmul.f32 %v1439_v52, %v1963_v1  ;;  %v900_v30 = vmul.f32 %v1439_v52, %v1961_v49 }
 0x3b5   : > { %1444 = vrcp.f32 %v852_v39 }
 0x3b6   : > { %933 = vst [vmem:[%s1715_s6 + $0x58] sm:$0xff] %v901_v6  ;;  %v1253_v11 = vpack.c.bf16 %v901_v6, %v899_v4  ;;  %932 = vst [vmem:[%s1715_s6 + $0x50] sm:$0xff] %v900_v30  ;;  %v1255_v58 = vpack.c.bf16 %v900_v30, %v898_v54 }
 0x3b7   : > { %v1441_v24 = vpop.eup %1440 }
 0x3b8   : > { %1254 = vmatprep.subr.bf16.mxu1 %v1253_v11  ;;  %v855_v44 = vpop.xlane.xlu1 %854  ;;  %v903_v29 = vmul.f32 %v1441_v24, %v1971_v22  ;;  %v902_v41 = vmul.f32 %v1441_v24, %v1969_v56 }
 0x3b9   : > { %1446 = vrcp.f32 %v855_v44  ;;  %1256 = vmatpush1.bf16.xpose.msra.mxu1 %v1255_v58 }
 0x3ba   : > { %935 = vst [vmem:[%s1715_s6 + $0x68] sm:$0xff] %v903_v29  ;;  %934 = vst [vmem:[%s1715_s6 + $0x60] sm:$0xff] %v902_v41 }
 0x3bb   : > { %v1443_v1 = vpop.eup %1442 }
 0x3bc   : > { %v858_v49 = vpop.xlane.xlu1 %857  ;;  %v905_v28 = vmul.f32 %v1443_v1, %v1979_v26  ;;  %v904_v0 = vmul.f32 %v1443_v1, %v1977_v61 }
 0x3bd   : > { %1448 = vrcp.f32 %v858_v49 }
 0x3be   : > { %937 = vst [vmem:[%s1715_s6 + $0x78] sm:$0xff] %v905_v28  ;;  %v1257_v35 = vpack.c.bf16 %v905_v28, %v903_v29  ;;  %936 = vst [vmem:[%s1715_s6 + $0x70] sm:$0xff] %v904_v0  ;;  %v1259_v22 = vpack.c.bf16 %v904_v0, %v902_v41 }
 0x3bf   : > { %v1445_v40 = vpop.eup %1444 }
 0x3c0   : > { %1258 = vmatprep.subr.bf16.mxu1 %v1257_v35  ;;  %v861_v56 = vpop.xlane.xlu1 %860  ;;  %v907_v45 = vmul.f32 %v1445_v40, %v1987_v43  ;;  %v906_v37 = vmul.f32 %v1445_v40, %v1985_v2 }
 0x3c1   : > { %1450 = vrcp.f32 %v861_v56  ;;  %1260 = vmatpush1.bf16.xpose.msra.mxu1 %v1259_v22 }
 0x3c2   : > { %939 = vst [vmem:[%s1715_s6 + $0x88] sm:$0xff] %v907_v45  ;;  %938 = vst [vmem:[%s1715_s6 + $0x80] sm:$0xff] %v906_v37 }
 0x3c3   : > { %v1447_v26 = vpop.eup %1446 }
 0x3c4   : > { %v864_v61 = vpop.xlane.xlu1 %863  ;;  %v909_v46 = vmul.f32 %v1447_v26, %v1995_v55  ;;  %v908_v5 = vmul.f32 %v1447_v26, %v1993_v7 }
 0x3c5   : > { %1452 = vrcp.f32 %v864_v61 }
 0x3c6   : > { %941 = vst [vmem:[%s1715_s6 + $0x98] sm:$0xff] %v909_v46  ;;  %v1261_v48 = vpack.c.bf16 %v909_v46, %v907_v45  ;;  %940 = vst [vmem:[%s1715_s6 + $0x90] sm:$0xff] %v908_v5  ;;  %v1263_v43 = vpack.c.bf16 %v908_v5, %v906_v37 }
 0x3c7   : > { %v1449_v53 = vpop.eup %1448 }
 0x3c8   : > { %1262 = vmatprep.subr.bf16.mxu1 %v1261_v48  ;;  %v867_v2 = vpop.xlane.xlu0 %866  ;;  %v911_v9 = vmul.f32 %v1449_v53, %v2003_v62  ;;  %v910_v42 = vmul.f32 %v1449_v53, %v2001_v16 }
 0x3c9   : > { %1454 = vrcp.f32 %v867_v2  ;;  %1264 = vmatpush1.bf16.xpose.msra.mxu1 %v1263_v43 }
 0x3ca   : > { %943 = vst [vmem:[%s1715_s6 + $0xa8] sm:$0xff] %v911_v9  ;;  %942 = vst [vmem:[%s1715_s6 + $0xa0] sm:$0xff] %v910_v42 }
 0x3cb   : > { %v1451_v55 = vpop.eup %1450 }
 0x3cc   : > { %v870_v7 = vpop.xlane.xlu1 %869  ;;  %v913_v57 = vmul.f32 %v1451_v55, %v2011_v17  ;;  %v912_v13 = vmul.f32 %v1451_v55, %v2009_v25 }
 0x3cd   : > { %1456 = vrcp.f32 %v870_v7 }
 0x3ce   : > { %945 = vst [vmem:[%s1715_s6 + $0xb8] sm:$0xff] %v913_v57  ;;  %v1265_v10 = vpack.c.bf16 %v913_v57, %v911_v9  ;;  %944 = vst [vmem:[%s1715_s6 + $0xb0] sm:$0xff] %v912_v13  ;;  %v1267_v62 = vpack.c.bf16 %v912_v13, %v910_v42 }
 0x3cf   : > { %v1453_v16 = vpop.eup %1452 }
 0x3d0   : > { %1266 = vmatprep.subr.bf16.mxu1 %v1265_v10  ;;  %v873_v60 = vpop.xlane.xlu0 %872  ;;  %v915_v8 = vmul.f32 %v1453_v16, %v2019_v15  ;;  %v914_v19 = vmul.f32 %v1453_v16, %v2017_v33 }
 0x3d1   : > { %1458 = vrcp.f32 %v873_v60  ;;  %1268 = vmatpush1.bf16.xpose.msra.mxu1 %v1267_v62 }
 0x3d2   : > { %947 = vst [vmem:[%s1715_s6 + $0xc8] sm:$0xff] %v915_v8  ;;  %946 = vst [vmem:[%s1715_s6 + $0xc0] sm:$0xff] %v914_v19 }
 0x3d3   : > { %v1455_v25 = vpop.eup %1454 }
 0x3d4   : > { %v917_v17 = vmul.f32 %v1455_v25, %v2025_v38  ;;  %v916_v63 = vmul.f32 %v1455_v25, %v2023_v59 }
 0x3d6   : > { %949 = vst [vmem:[%s1715_s6 + $0xd8] sm:$0xff] %v917_v17  ;;  %v1269_v47 = vpack.c.bf16 %v917_v17, %v915_v8  ;;  %948 = vst [vmem:[%s1715_s6 + $0xd0] sm:$0xff] %v916_v63  ;;  %v1271_v20 = vpack.c.bf16 %v916_v63, %v914_v19 }
 0x3d7   : > { %v1457_v15 = vpop.eup %1456 }
 0x3d8   : > { %1270 = vmatprep.subr.bf16.mxu1 %v1269_v47  ;;  %v919_v33 = vmul.f32 %v1457_v15, %v2031_v23  ;;  %v918_v27 = vmul.f32 %v1457_v15, %v2029_v18  ;;  %v954_v23 = vld [vmem:[#allocation2 + $0x20] sm:$0xff]  ;;  %v957_v18 = vld [vmem:[#allocation2 + $0x38] sm:$0xff] }
 0x3d9   : > { %1272 = vmatpush1.bf16.xpose.msra.mxu1 %v1271_v20 }
 0x3da   : > { %951 = vst [vmem:[%s1715_s6 + $0xe8] sm:$0xff] %v919_v33  ;;  %950 = vst [vmem:[%s1715_s6 + $0xe0] sm:$0xff] %v918_v27 }
 0x3db   : > { %v1459_v12 = vpop.eup %1458 }
 0x3dc   : > { %v921_v38 = vmul.f32 %v1459_v12, %v2037_v31  ;;  %v920_v59 = vmul.f32 %v1459_v12, %v2035_v32 }
 0x3de   : > { %953 = vst [vmem:[%s1715_s6 + $0xf8] sm:$0xff] %v921_v38  ;;  %v1273_v21 = vpack.c.bf16 %v921_v38, %v919_v33  ;;  %952 = vst [vmem:[%s1715_s6 + $0xf0] sm:$0xff] %v920_v59  ;;  %v1275_v14 = vpack.c.bf16 %v920_v59, %v918_v27  ;;  %s1466_s6 = scalar_lea.vmem %s1465_s3, 8192 }
 0x3df   : > { %p1468_p5 = scmp.lt.s32.totalorder %s1466_s6, %s1460_s16 }
 0x3e0   : > { %1274 = vmatprep.subr.bf16.mxu1 %v1273_v21 }
 0x3e1   : > { %1276 = vmatpush1.bf16.xpose.msra.mxu1 %v1275_v14  ;;  %p1469_p6 = por %p1468_p5, %p1467_p4 }
 0x3e3   : > { %p1470_p7 = pnand %p1469_p6, %p1463_p2 }
 0x3e8   : > { %1023 = vmatmul.mubr.f32.vlgmr.msra.gmra.mrb[0].mxu1 %v954_v23 }
 0x3e9   : > { %1027 = vmatprep.mubr.f32.mxu1 %v957_v18 }
 0x3ec   : > { %1028 = vmatmul.mubr.f32.gmra.mrb[2].mxu1 %v956_v36 }
 0x3ed   : > { %1473 = shalt.err (!%p1470_p7)
}
 0x3ee   : > { %s1474_s17 = scalar_lea.hbm %s2111_s14, 4096  ;;  %s1478_s0 = scalar_lea.hbm %s2213_s5, 16384 }
 0x3ef   : > { %p1475_p9 = scmp.ne.s32.totalorder %s2111_s14, %s1474_s17  ;;  %p1479_p12 = scmp.lt.u32.totalorder %s2111_s14, %s2213_s5 }
 0x3f0   : > { %p1480_p13 = scmp.lt.u32.totalorder %s1478_s0, %s1474_s17  ;;  %p1482_p1 = scmp.lt.u32.totalorder %s1474_s17, %s2111_s14 }
 0x3f1   : > { %p1476_p10 = pnand %p1475_p9, %p1681_p3 }
 0x3f2   : > { %p1481_p0 = por %p1480_p13, %p1479_p12 }
 0x3f3   : > { %p1477_p11 = pneg %p1476_p10 }
 0x3f4   : > { %p1483_p2 = por %p1482_p1, %p1481_p0 }
 0x3f6   : > { %p1484_p4 = pnand %p1483_p2, %p1477_p11 }
 0x3f8   : > { %1487 = shalt.err (!%p1484_p4)
}
 0x3f9   : > { %s1592_s16 = smov 256   ;;  %s1593_s3 = smov 16  }
 0x3fa   : > { %1280 = dma.vmem_to_hbm [thread:$0]  (%p1681_p3), %s2113_s9, 4096, %s2111_s14, %s1047_s15, %s1592_s16, %s1592_s16, %s1593_s3  }
 0x3fb   : > { %s1033_s6 = sld [smem:[#allocation3]]  ;;  %s1227_s17 = sshll.u32 %s1574_s24, 2 }
 0x3fc   : > { %s1058_s18 = sadd.s32 %s1570_s23, %s1227_s17  ;;  %s1061_s0 = sshll.u32 %s1713_s28, 4  ;;  %s2151_s0 = int_to_ptr.vmem [resolvable:$true] %s1061_s0 }
 0x3fd   : > { %s1228_s19 = sshll.u32 %s1058_s18, 7  ;;  %s1042_s23 = scalar_lea.sflag [#allocation5], %s1702_s13 }
 0x3fe   : > { %s2149_s24 = scalar_lea.hbm %s2212_s4, %s1228_s19  ;;  %s1488_s14 = scalar_lea.vmem %s2151_s0, 256 }
 0x3ff   : > { %p1489_p5 = scmp.ne.s32.totalorder %s2151_s0, %s1488_s14  ;;  %s1594_s15 = smov [#allocation4]  }
 0x400   : > { %s1492_s11 = sshll.u32 %s1594_s15, 4  ;;  %s1493_s11 = int_to_ptr.vmem [resolvable:$false] %s1492_s11 }
 0x401   : > { %v1034_v32 = vstv %s1033_s6  ;;  %p1490_p6 = pnand %p1489_p5, %p1681_p3  ;;  %s1494_s3 = scalar_lea.vmem %s1493_s11, 512 }
 0x402   : > { %p1495_p9 = scmp.lt.s32.totalorder %s2151_s0, %s1493_s11  ;;  %p1496_p10 = scmp.lt.s32.totalorder %s1494_s3, %s1488_s14 }
 0x403   : > { %p1491_p7 = pneg %p1490_p6 }
 0x404   : > { %p1497_p11 = por %p1496_p10, %p1495_p9 }
 0x406   : > { %p1498_p12 = pnand %p1497_p11, %p1491_p7 }
 0x4bb   : > { %v1024_v31 = vpop.f32.mrb[0].mxu1 }
 0x4bc   : > { %v1035_v3 = vmul.f32 %v1034_v32, %v1024_v31  ;;  %v1026_v34 = vpop.f32.mrb[1].mxu1 }
 0x4be   : > { %v1037_v4 = vadd.f32 %v1035_v3, %v1759_v50 }
 0x4bf   : > { %v1029_v54 = vpop.f32.mrb[2].mxu1 }
 0x4c0   : > { %1039 = vst [vmem:[%s1713_s28] sm:$0xff] %v1037_v4  ;;  %v1036_v52 = vmul.f32 %v1034_v32, %v1029_v54  ;;  %v1031_v39 = vpop.f32.mrb[3].mxu1 }
 0x4c2   : > { %v1038_v6 = vadd.f32 %v1036_v52, %v1762_v51 }
 0x4c4   : > { %1040 = vst [vmem:[%s1713_s28 + $0x8] sm:$0xff] %v1038_v6 }
 0x4c5   : > { %1501 = shalt.err (!%p1498_p12)
}
 0x4c6   : > { %s1502_s28 = scalar_lea.hbm %s2149_s24, 256  ;;  %s1506_s18 = scalar_lea.hbm %s2212_s4, 1024 }
 0x4c7   : > { %p1503_p13 = scmp.ne.s32.totalorder %s2149_s24, %s1502_s28  ;;  %p1507_p2 = scmp.lt.u32.totalorder %s2149_s24, %s2212_s4 }
 0x4c8   : > { %p1508_p4 = scmp.lt.u32.totalorder %s1506_s18, %s1502_s28  ;;  %p1510_p6 = scmp.lt.u32.totalorder %s1502_s28, %s2149_s24 }
 0x4c9   : > { %p1504_p0 = pnand %p1503_p13, %p1681_p3 }
 0x4ca   : > { %p1509_p5 = por %p1508_p4, %p1507_p2 }
 0x4cb   : > { %p1505_p1 = pneg %p1504_p0 }
 0x4cc   : > { %p1511_p7 = por %p1510_p6, %p1509_p5 }
 0x4ce   : > { %p1512_p9 = pnand %p1511_p7, %p1505_p1 }
 0x4d0   : > { %1515 = shalt.err (!%p1512_p9)
}
 0x4d1   : > { %s1595_s9 = smov 128   ;;  %s1596_s14 = smov 8  }
 0x4d2   : > { %1279 = dma.vmem_to_hbm [thread:$0]  (%p1681_p3), %s2151_s0, 256, %s2149_s24, %s1042_s23, %s1595_s9, %s1592_s16, %s1596_s14  }
 0x4d3 PF: > { %p1290_p10 = scmp.ge.s32.totalorder %s1586_s27, 2  ;;  %s1095_s15 = sand.u32 1, %s1558_s20  }
 0x4d4   : > { %s1096_s11 = scalar_lea.sflag [#allocation5], %s1095_s15 }
 0x4d5   : > { %p1284_p11 = pnand %p1290_p10, %p1690_p8 }
 0x4d7   : > { %1549 = dma.done.wait (!%p1284_p11), %s1096_s11, 256  }
 0x4d8   : > { %1551 = vsyncadd (!%p1284_p11), %s1096_s11, 4294967040  ;;  %s1105_s3 = scalar_lea.sflag [#allocation7], %s1095_s15 }
 0x4d9   : > { %1553 = dma.done.wait (!%p1284_p11), %s1105_s3, 4096  }
 0x4da   : > { %1555 = vsyncadd (!%p1284_p11), %s1105_s3, 4294963200  ;;  %s23_s27 = sadd.s32 1, %s1586_s27   ;;  %s2218_s20 = smov %s1562_s21 }
 0x4db   : > { %p20_p12 = scmp.ge.s32.totalorder %s23_s27, 6   ;;  %s2219_s21 = smov %s1566_s22 }
 0x4dc   : > { %s2220_s22 = smov %s1699_s12  ;;  %s2221_s23 = smov %s1578_s25 }
 0x4dd   : > { %s2222_s24 = smov %s1582_s26  ;;  %s2223_s25 = smov %s2226_s29 }
 0x4de   : > { %s2224_s26 = smov %s2230_s30  ;;  %22 = sbr.rel (!%p20_p12) target bundleno = 10 (0xa), region = 94 }
 0x4e5   :  { %1110 = vsyncpa [#allocation5], 1 }
 0x4e6   :  { %1112 = vsyncpa [#allocation5 + $0x1], 1 }
 0x4e7   :  { %1113 = vsyncpa [#allocation7], 1 }
 0x4e8   :  { %1115 = vsyncpa [#allocation7 + $0x1], 1 }

</bundles_post_ra>
